<compile_context>
chip_gen: v7x
topology: tpu7x:2x2x1
jax: 0.10.0
libtpu: 0.0.40
codegen_flags: <defaults>
</compile_context>

<pallas_src>
import functools

import numpy as np
import jax
import jax.numpy as jnp
from jax.experimental import pallas as pl
from jax.experimental.pallas import tpu as pltpu


# ---------------------------------------------------------------------------
# Glue: circulant temporal Gaussian matrix (circular padding => loopable).
# TODO(synk): maua's gaussian_filter switches to reflect-style padding when
#             radius > n_frames // 2; here circular wrap is always used.
# ---------------------------------------------------------------------------
def circulant_gaussian(loop_len: int, sigma: float) -> jnp.ndarray:
    radius = max(1, int(4 * sigma))
    offs = np.arange(-radius, radius + 1, dtype=np.float32)
    k = np.exp(-0.5 * (offs / sigma) ** 2)
    k /= k.sum()
    g = np.zeros((loop_len, loop_len), np.float32)
    for d, w in zip(range(-radius, radius + 1), k):
        for t in range(loop_len):
            g[t, (t + d) % loop_len] += w
    return jnp.asarray(g)


def _choose_tile(P: int, L: int) -> int:
    """Lane-dense pixel tile: multiple of 128 dividing P, sized so the
    double-buffered (L, TP) in+out blocks stay well inside the smallest
    (v5e: 16 MiB) default scoped-VMEM budget (also fine on v7x's 64 MiB)."""
    if P % 128 != 0:
        return P  # small / odd frame: single full-width block
    budget_bytes = 4 << 20                            # budget for pipelined tiles
    cap = max(128, budget_bytes // (4 * L * 2 * 2))   # fp32, in+out, 2 buffers each
    for cand in (2048, 1024, 512, 256, 128):
        if cand <= cap and P % cand == 0:
            return cand
    return 128


# ---------------------------------------------------------------------------
# Pallas kernel 1a: temporal blur + per-frame sum / sum-of-squares, tiled
# over the pixel axis P (reduction axis for the statistics).
#   blurred_tile = G @ x_tile                 (MXU; K = L is small, accepted)
#   sum/sumsq   += per-frame partials         ((L, 1) VMEM accumulators)
#   on last tile: std (ddof=1) -> fstd = G @ std -> scale = 1 / fstd
# ---------------------------------------------------------------------------
def _blur_stats_kernel(x_ref, g_ref, blurred_ref, scale_ref, sum_ref, sumsq_ref,
                       *, total_p: int):
    p = pl.program_id(0)

    @pl.when(p == 0)
    def _init():
        sum_ref[...] = jnp.zeros_like(sum_ref)
        sumsq_ref[...] = jnp.zeros_like(sumsq_ref)

    g = g_ref[...]                                              # (L, L)
    blurred = jnp.dot(g, x_ref[...],                            # (L, TP)
                      preferred_element_type=jnp.float32)
    blurred_ref[...] = blurred
    sum_ref[...] += jnp.sum(blurred, axis=1, keepdims=True)
    sumsq_ref[...] += jnp.sum(blurred * blurred, axis=1, keepdims=True)

    @pl.when(p == pl.num_programs(0) - 1)
    def _finalize():
        n = jnp.float32(total_p)
        mean = sum_ref[...] / n
        # unbiased (ddof=1) variance, as torch .std((1,2,3)); degenerate if n == 1
        var = (sumsq_ref[...] - n * mean * mean) / (n - 1.0)
        std = jnp.sqrt(var)                                     # (L, 1)
        fstd = jnp.dot(g, std, preferred_element_type=jnp.float32)
        scale_ref[...] = pl.reciprocal(fstd, approx=False)      # per-frame 1/fstd


# ---------------------------------------------------------------------------
# Pallas kernel 1b: per-frame normalization pass, fully parallel over P tiles.
# ---------------------------------------------------------------------------
def _scale_kernel(blurred_ref, scale_ref, out_ref):
    out_ref[...] = blurred_ref[...] * scale_ref[...]


def build_loop_noise(x2d: jnp.ndarray, g: jnp.ndarray) -> jnp.ndarray:
    L, P = x2d.shape
    tp = _choose_tile(P, L)
    n_tiles = P // tp

    blurred, scale = pl.pallas_call(
        functools.partial(_blur_stats_kernel, total_p=P),
        out_shape=(jax.ShapeDtypeStruct((L, P), jnp.float32),
                   jax.ShapeDtypeStruct((L, 1), jnp.float32)),
        grid_spec=pltpu.PrefetchScalarGridSpec(
            num_scalar_prefetch=0,
            grid=(n_tiles,),
            in_specs=[
                pl.BlockSpec((L, tp), lambda p: (0, p)),
                pl.BlockSpec((L, L), lambda p: (0, 0)),
            ],
            out_specs=[
                pl.BlockSpec((L, tp), lambda p: (0, p)),
                pl.BlockSpec((L, 1), lambda p: (0, 0)),     # resident accumulator output
            ],
            scratch_shapes=[
                pltpu.VMEM((L, 1), jnp.float32),            # per-frame sum
                pltpu.VMEM((L, 1), jnp.float32),            # per-frame sum of squares
            ],
        ),
        compiler_params=pltpu.CompilerParams(
            dimension_semantics=("arbitrary",)),            # P axis carries the stat reduction
    )(x2d, g)

    # Pass 2: normalize each frame; output aliases the blurred buffer (no extra HBM alloc).
    noise2d = pl.pallas_call(
        _scale_kernel,
        out_shape=jax.ShapeDtypeStruct((L, P), jnp.float32),
        grid_spec=pltpu.PrefetchScalarGridSpec(
            num_scalar_prefetch=0,
            grid=(n_tiles,),
            in_specs=[
                pl.BlockSpec((L, tp), lambda p: (0, p)),
                pl.BlockSpec((L, 1), lambda p: (0, 0)),
            ],
            out_specs=pl.BlockSpec((L, tp), lambda p: (0, p)),
        ),
        compiler_params=pltpu.CompilerParams(
            dimension_semantics=("parallel",)),
        input_output_aliases={0: 0},
    )(blurred, scale)
    return noise2d


# ---------------------------------------------------------------------------
# Pallas kernel 2: forward() frame selection — noise[[index % loop_len]].
# The gather happens in the BlockSpec index_map (scalar-prefetch index), so
# only one (1, 1, P) row is DMA'd per call.
# ---------------------------------------------------------------------------
def _select_kernel(idx_ref, noise_ref, out_ref):
    del idx_ref  # used only by the index_map; the gather is done by the block DMA
    out_ref[...] = noise_ref[...]


def select_frame(index: int, noise3d: jnp.ndarray) -> jnp.ndarray:
    L, _, P = noise3d.shape
    return pl.pallas_call(
        _select_kernel,
        out_shape=jax.ShapeDtypeStruct((1, 1, P), jnp.float32),
        grid_spec=pltpu.PrefetchScalarGridSpec(
            num_scalar_prefetch=1,
            grid=(1,),
            in_specs=[pl.BlockSpec((1, 1, P), lambda i, idx: (idx[0] % L, 0, 0))],
            out_specs=pl.BlockSpec((1, 1, P), lambda i, idx: (0, 0, 0)),
        ),
    )(jnp.asarray([index], dtype=jnp.int32), noise3d)


# ---------------------------------------------------------------------------
# Module wrapper (host-side Python state for the loop index, like the buffer
# + integer attribute in the torch module).
# ---------------------------------------------------------------------------
class LoopNoise:
    def __init__(self, loop_len: int, size: int, smooth: float, key):
        x = jax.random.normal(key, (loop_len, 1, size, size), dtype=jnp.float32)
        g = circulant_gaussian(loop_len, smooth)
        x2d = x.reshape(loop_len, 1 * size * size)           # (L, P), NCHW pixel order
        noise2d = build_loop_noise(x2d, g)                   # normalized loop noise
        # (L, 1, P) view so the select block's last two dims equal the full array dims.
        self.noise3d = noise2d.reshape(loop_len, 1, size * size)
        self.size = size
        self.index, self.length = 0, loop_len

    def forward(self):
        # TODO(synk): if a consumer pulls many frames per step, add a batched
        #             multi-row gather to amortize the per-call dispatch cost.
        out = select_frame(self.index, self.noise3d)         # (1, 1, P)
        self.index += 1
        return out.reshape(1, 1, self.size, self.size)       # (1, 1, H, W)


if __name__ == "__main__":
    key = jax.random.PRNGKey(0)
    # P = 64*64 = 4096 -> two (8, 2048) tiles: exercises the pipelined P reduction.
    loop_len, size, smooth = 8, 64, 1.5

    mod = LoopNoise(loop_len, size, smooth, key)

    out0 = mod.forward()
    out1 = mod.forward()
    jax.block_until_ready(out0)
    jax.block_until_ready(out1)

    assert out0.shape == (1, 1, size, size), out0.shape
    assert out1.shape == (1, 1, size, size), out1.shape
    assert mod.index == 2
    assert bool(jnp.all(jnp.isfinite(out0))) and bool(jnp.all(jnp.isfinite(out1)))

    # Float64 host reference of the init math + frame select.
    x_ref = np.asarray(
        jax.random.normal(key, (loop_len, 1, size, size), dtype=jnp.float32), np.float64)
    g_ref = np.asarray(circulant_gaussian(loop_len, smooth), np.float64)
    x2d_ref = x_ref.reshape(loop_len, size * size)
    blurred_ref = g_ref @ x2d_ref
    std_ref = blurred_ref.std(axis=1, ddof=1, keepdims=True)
    ref = (blurred_ref / (g_ref @ std_ref)).reshape(loop_len, 1, size, size)

    np.testing.assert_allclose(np.asarray(out0)[0], ref[0], rtol=1e-2, atol=1e-2)
    np.testing.assert_allclose(np.asarray(out1)[0], ref[1], rtol=1e-2, atol=1e-2)

    print("KERNEL_OK")
</pallas_src>

<mosaic_0001>
module attributes {stable_mosaic.version = 11 : i64} {
  func.func @_blur_stats_kernel(%arg0: i32, %arg1: memref<8x2048xf32, #tpu.memory_space<vmem>>, %arg2: memref<8x8xf32, #tpu.memory_space<vmem>>, %arg3: memref<8x2048xf32, #tpu.memory_space<vmem>>, %arg4: memref<8x1xf32, #tpu.memory_space<vmem>>, %arg5: memref<8x1xf32, #tpu.memory_space<vmem>>, %arg6: memref<8x1xf32, #tpu.memory_space<vmem>>) attributes {dimension_semantics = [#tpu.dimension_semantics<arbitrary>], iteration_bounds = array<i64: 2>, scalar_prefetch = 0 : i64, scratch_operands = 2 : i64, tpu.core_type = #tpu.core_type<tc>, window_params = [{transform_indices = @transform_0, window_bounds = array<i64: 8, 2048>}, {pipeline_mode = #tpu.pipeline_mode<synchronous>, transform_indices = @transform_1, window_bounds = array<i64: 8, 8>}, {transform_indices = @transform_2, window_bounds = array<i64: 8, 2048>}, {pipeline_mode = #tpu.pipeline_mode<synchronous>, transform_indices = @transform_3, window_bounds = array<i64: 8, 1>}]} {
    %c0_i32 = arith.constant 0 : i32
    %0 = arith.cmpi eq, %arg0, %c0_i32 : i32
    %1 = arith.extui %0 : i1 to i32
    %c0_i32_0 = arith.constant 0 : i32
    %2 = arith.cmpi ne, %1, %c0_i32_0 : i32
    scf.if %2 {
      %cst_17 = arith.constant 0.000000e+00 : f32
      %21 = vector.broadcast %cst_17 : f32 to vector<8x1xf32>
      %c0_18 = arith.constant 0 : index
      %c0_19 = arith.constant 0 : index
      %22 = vector.load %arg5[%c0_18, %c0_19] : memref<8x1xf32, #tpu.memory_space<vmem>>, vector<8x1xf32>
      tpu.vector_store %arg5[%c0_18, %c0_19], %21 {strides = array<i32>} : memref<8x1xf32, #tpu.memory_space<vmem>>, vector<8x1xf32>,
      %cst_20 = arith.constant 0.000000e+00 : f32
      %23 = vector.broadcast %cst_20 : f32 to vector<8x1xf32>
      %c0_21 = arith.constant 0 : index
      %c0_22 = arith.constant 0 : index
      %24 = vector.load %arg6[%c0_21, %c0_22] : memref<8x1xf32, #tpu.memory_space<vmem>>, vector<8x1xf32>
      tpu.vector_store %arg6[%c0_21, %c0_22], %23 {strides = array<i32>} : memref<8x1xf32, #tpu.memory_space<vmem>>, vector<8x1xf32>,
    } else {
    }
    %c0 = arith.constant 0 : index
    %c0_1 = arith.constant 0 : index
    %3 = vector.load %arg2[%c0, %c0_1] : memref<8x8xf32, #tpu.memory_space<vmem>>, vector<8x8xf32>
    %c0_2 = arith.constant 0 : index
    %c0_3 = arith.constant 0 : index
    %4 = vector.load %arg1[%c0_2, %c0_3] : memref<8x2048xf32, #tpu.memory_space<vmem>>, vector<8x2048xf32>
    %cst = arith.constant dense<0.000000e+00> : vector<8x2048xf32>
    %5 = tpu.matmul %3, %4, %cst {dimension_numbers = #tpu.dot_dimension_numbers<[1], [0], [0], [1], [0, 0, 1, 1], [], []>} : vector<8x8xf32>, vector<8x2048xf32>, vector<8x2048xf32> -> vector<8x2048xf32>
    %c0_4 = arith.constant 0 : index
    %c0_5 = arith.constant 0 : index
    %6 = vector.load %arg3[%c0_4, %c0_5] : memref<8x2048xf32, #tpu.memory_space<vmem>>, vector<8x2048xf32>
    tpu.vector_store %arg3[%c0_4, %c0_5], %5 {strides = array<i32>} : memref<8x2048xf32, #tpu.memory_space<vmem>>, vector<8x2048xf32>,
    %c0_6 = arith.constant 0 : index
    %c0_7 = arith.constant 0 : index
    %7 = vector.load %arg5[%c0_6, %c0_7] : memref<8x1xf32, #tpu.memory_space<vmem>>, vector<8x1xf32>
    %cst_8 = arith.constant dense<0.000000e+00> : vector<8xf32>
    %8 = vector.multi_reduction <add>, %5, %cst_8 [1] : vector<8x2048xf32> to vector<8xf32>
    %9 = vector.shape_cast %8 : vector<8xf32> to vector<8x1xf32>
    %10 = arith.addf %7, %9 : vector<8x1xf32>
    %c0_9 = arith.constant 0 : index
    %c0_10 = arith.constant 0 : index
    %11 = vector.load %arg5[%c0_9, %c0_10] : memref<8x1xf32, #tpu.memory_space<vmem>>, vector<8x1xf32>
    tpu.vector_store %arg5[%c0_9, %c0_10], %10 {strides = array<i32>} : memref<8x1xf32, #tpu.memory_space<vmem>>, vector<8x1xf32>,
    %c0_11 = arith.constant 0 : index
    %c0_12 = arith.constant 0 : index
    %12 = vector.load %arg6[%c0_11, %c0_12] : memref<8x1xf32, #tpu.memory_space<vmem>>, vector<8x1xf32>
    %13 = arith.mulf %5, %5 : vector<8x2048xf32>
    %cst_13 = arith.constant dense<0.000000e+00> : vector<8xf32>
    %14 = vector.multi_reduction <add>, %13, %cst_13 [1] : vector<8x2048xf32> to vector<8xf32>
    %15 = vector.shape_cast %14 : vector<8xf32> to vector<8x1xf32>
    %16 = arith.addf %12, %15 : vector<8x1xf32>
    %c0_14 = arith.constant 0 : index
    %c0_15 = arith.constant 0 : index
    %17 = vector.load %arg6[%c0_14, %c0_15] : memref<8x1xf32, #tpu.memory_space<vmem>>, vector<8x1xf32>
    tpu.vector_store %arg6[%c0_14, %c0_15], %16 {strides = array<i32>} : memref<8x1xf32, #tpu.memory_space<vmem>>, vector<8x1xf32>,
    %c1_i32 = arith.constant 1 : i32
    %18 = arith.cmpi eq, %arg0, %c1_i32 : i32
    %19 = arith.extui %18 : i1 to i32
    %c0_i32_16 = arith.constant 0 : i32
    %20 = arith.cmpi ne, %19, %c0_i32_16 : i32
    scf.if %20 {
      %c0_17 = arith.constant 0 : index
      %c0_18 = arith.constant 0 : index
      %21 = vector.load %arg5[%c0_17, %c0_18] : memref<8x1xf32, #tpu.memory_space<vmem>>, vector<8x1xf32>
      %cst_19 = arith.constant 4.096000e+03 : f32
      %22 = vector.broadcast %cst_19 : f32 to vector<8x1xf32>
      %23 = arith.divf %21, %22 : vector<8x1xf32>
      %c0_20 = arith.constant 0 : index
      %c0_21 = arith.constant 0 : index
      %24 = vector.load %arg6[%c0_20, %c0_21] : memref<8x1xf32, #tpu.memory_space<vmem>>, vector<8x1xf32>
      %cst_22 = arith.constant 4.096000e+03 : f32
      %25 = vector.broadcast %cst_22 : f32 to vector<8x1xf32>
      %26 = arith.mulf %25, %23 : vector<8x1xf32>
      %27 = arith.mulf %26, %23 : vector<8x1xf32>
      %28 = arith.subf %24, %27 : vector<8x1xf32>
      %cst_23 = arith.constant 4.096000e+03 : f32
      %cst_24 = arith.constant 1.000000e+00 : f32
      %29 = arith.subf %cst_23, %cst_24 : f32
      %30 = vector.broadcast %29 : f32 to vector<8x1xf32>
      %31 = arith.divf %28, %30 : vector<8x1xf32>
      %32 = math.sqrt %31 : vector<8x1xf32>
      %cst_25 = arith.constant dense<0.000000e+00> : vector<8x1xf32>
      %33 = tpu.matmul %3, %32, %cst_25 {dimension_numbers = #tpu.dot_dimension_numbers<[1], [0], [0], [1], [0, 0, 1, 1], [], []>} : vector<8x8xf32>, vector<8x1xf32>, vector<8x1xf32> -> vector<8x1xf32>
      %34 = tpu.reciprocal %33 : vector<8x1xf32> -> vector<8x1xf32>
      %c0_26 = arith.constant 0 : index
      %c0_27 = arith.constant 0 : index
      %35 = vector.load %arg4[%c0_26, %c0_27] : memref<8x1xf32, #tpu.memory_space<vmem>>, vector<8x1xf32>
      tpu.vector_store %arg4[%c0_26, %c0_27], %34 {strides = array<i32>} : memref<8x1xf32, #tpu.memory_space<vmem>>, vector<8x1xf32>,
    } else {
    }
    return
  }
  func.func @transform_0(%arg0: i32) -> (i32, i32) {
    %c0_i32 = arith.constant 0 : i32
    %c0_i32_0 = arith.constant 0 : i32
    return %c0_i32, %arg0 : i32, i32
  }
  func.func @transform_1(%arg0: i32) -> (i32, i32) {
    %c0_i32 = arith.constant 0 : i32
    %c0_i32_0 = arith.constant 0 : i32
    %c0_i32_1 = arith.constant 0 : i32
    return %c0_i32, %c0_i32_0 : i32, i32
  }
  func.func @transform_2(%arg0: i32) -> (i32, i32) {
    %c0_i32 = arith.constant 0 : i32
    %c0_i32_0 = arith.constant 0 : i32
    return %c0_i32, %arg0 : i32, i32
  }
  func.func @transform_3(%arg0: i32) -> (i32, i32) {
    %c0_i32 = arith.constant 0 : i32
    %c0_i32_0 = arith.constant 0 : i32
    %c0_i32_1 = arith.constant 0 : i32
    return %c0_i32, %c0_i32_0 : i32, i32
  }
}

</mosaic_0001>

<bundles_post_ra>
// kernel: tpu_custom_call.1
= control target key start
LH: loop header
LB: loop body
LE: loop exit
PB: predicated region body
PF: predicated region fallthrough
CT: control target
= control target key end

     0   :  { %9 = vsyncpa [#allocation5], 0  ;;  %s1582_s0 = inlined_call_operand.hbm [shape: f32[8,4096], index: 0, kind: input, shape index: {}]   ;;  %s1583_s1 = inlined_call_operand.hbm [shape: f32[8,8], index: 1, kind: input, shape index: {}]   ;;  %s1584_s2 = inlined_call_operand.hbm [shape: f32[8,4096], index: 2, kind: output, shape index: {0}]   ;;  %s1585_s3 = inlined_call_operand.vmem [shape: f32[8,1], index: 3, kind: output, shape index: {1}]  }
   0x1   :  { %11 = vsyncpa [#allocation5 + $0x1], 0 }
   0x2   :  { %12 = vsyncpa [#allocation8], 0 }
   0x3   :  { %13 = vsyncpa [#allocation6], 0 }
   0x4   :  { %15 = vsyncpa [#allocation6 + $0x1], 0  ;;  %s1320_s12 = smov 0   ;;  %s1322_s13 = smov 0  }
   0x5   :  { %s1324_s14 = smov 0   ;;  %s1326_s15 = smov 0  }
   0x6 LB: > { %s1341_s16 = sadd.s32 4294967295, %s1291_s15   ;;  %s1062_s17 = sadd.s32 4294967294, %s1291_s15   ;;  %s1291_s15 = sphi %s1326_s15, %s1610_s15   ;;  %s1287_s14 = sphi %s1324_s14, %s1609_s14   ;;  %s1283_s13 = sphi %s1322_s13, %s1608_s13   ;;  %s1279_s12 = sphi %s1320_s12, %s1607_s12  }
   0x7   : > { %p41_p0 = scmp.ne.s32.totalorder %s1283_s13, %s1279_s12  ;;  %p1586_p1 = scmp.eq.s32.totalorder %s1341_s16, 0 }
   0x8   : > { %p92_p3 = scmp.eq.s32.totalorder %s1062_s17, 1  ;;  %p1063_p5 = scmp.ge.s32.totalorder %s1291_s15, 1 }
   0x9   : > { %p1350_p4 = por %p1586_p1, %p41_p0  ;;  %p120_p7 = scmp.lt.s32.totalorder %s1291_s15, 3 }
   0xa   : > { %p1355_p6 = por %p92_p3, %p41_p0  ;;  %s1293_s21 = smov [#allocation7]  }
   0xb   : > { %s1589_s18 = scalar_select %p1350_p4, 1, 0 }
   0xc   : > { %s1590_s19 = scalar_select %p1355_p6, 1, 0 }
   0xd   : > { %p1361_p9 = pnand %p1063_p5, %p120_p7  ;;  %s133_s22 = sshll.u32 %s1293_s21, 4  ;;  %s134_s22 = int_to_ptr.vmem [resolvable:$true] %s133_s22 }
   0xe   : > { %s1369_s23 = sadd.s32 1, %s1291_s15   ;;  %s28_s27 = sadd.s32 1, %s1287_s14 }
   0xf   : > { %s1591_s20 = scalar_select %p1361_p9, 1, 0 }
  0x10   : > { %p1106_p11 = pneg %p1361_p9  ;;  %s25_s25 = ssub.s32 %s1291_s15, %s1369_s23 }
  0x11   : > { %p1379_p13 = scmp.eq.s32.totalorder %s25_s25, 0  ;;  %s1163_s30 = scalar_lea.hbm %s1583_s1, 128 }
  0x12   : > { %p1373_p12 = pnand %p1106_p11, %p1586_p1  ;;  %p1164_p3 = scmp.ne.s32.totalorder %s1583_s1, %s1163_s30 }
  0x13   : > { %s1593_s26 = scalar_select %p1379_p13, 1, 0 }
  0x14   : > { %p1165_p5 = pneg %p1373_p12  ;;  %p1170_p10 = scmp.lt.u32.totalorder %s1163_s30, %s1583_s1 }
  0x16   : > { %p1166_p7 = pnand %p1165_p5, %p1164_p3 }
  0x18   : > { %p1167_p11 = pneg %p1166_p7 }
  0x1a   : > { %p1172_p8 = pnand %p1170_p10, %p1167_p11 }
  0x1c   : > { %1175 = shalt.err (!%p1172_p8)
}
  0x1d   : > { %s1176_s8 = scalar_lea.vmem %s134_s22, 128  ;;  %p1184_p6 = scmp.lt.s32.totalorder %s134_s22, %s134_s22 }
  0x1e   : > { %p1177_p1 = scmp.ne.s32.totalorder %s134_s22, %s1176_s8  ;;  %p1185_p4 = scmp.lt.s32.totalorder %s1176_s8, %s1176_s8 }
  0x20   : > { %p1179_p2 = pnand %p1177_p1, %p1165_p5  ;;  %p1186_p9 = por %p1185_p4, %p1184_p6 }
  0x22   : > { %p1180_p0 = pneg %p1179_p2 }
  0x24   : > { %p1187_p13 = pnand %p1186_p9, %p1180_p0 }
  0x26   : > { %1190 = shalt.err (!%p1187_p13)
}
  0x27   : > { %1109 = dma.hbm_to_vmem [thread:$0]  (!%p1373_p12), %s1583_s1, 128, %s134_s22, [#allocation8]  }
  0x28   : > { %p1594_p1 = scmp.ne.s32.totalorder %s1593_s26, 0  ;;  %p36_p2 = scmp.eq.s32.totalorder %s1291_s15, 0 }
  0x29   : > { %p1595_p4 = scmp.ne.s32.totalorder %s1287_s14, %s1283_s13  ;;  %p1596_p6 = scmp.eq.s32.totalorder %s1341_s16, 1 }
  0x2a   : > { %s1405_s11 = scalar_select %p1594_p1, %s1287_s14, %s28_s27  }
  0x2b   : > { %p1413_p8 = por %p1596_p6, %p1595_p4  ;;  %p1119_p9 = scmp.lt.s32.totalorder %s1291_s15, 2 }
  0x2c   : > { %s144_s21 = sand.u32 1, %s1287_s14   ;;  %p1598_p10 = pmov %p1595_p4 }
  0x2d   : > { %s1066_s24 = sshll.u32 %s144_s21, 7  ;;  %s1089_s25 = sshll.u32 %s1291_s15, 11 }
  0x2e   : > { %p37_p13 = por %p36_p2, %p1598_p10  ;;  %s1426_s22 = scalar_lea.hbm %s1582_s0, %s1089_s25 }
  0x2f   : > { %s148_s26 = scalar_lea.vmem [#allocation4], %s1066_s24  ;;  %s145_s4 = scalar_lea.sflag [#allocation5], %s144_s21 }
  0x30   : > { %s156_s27 = sshll.u32 %s148_s26, 4  ;;  %p1428_p12 = pnand %p1119_p9, %p37_p13  ;;  %s1432_s27 = int_to_ptr.vmem [resolvable:$true] %s156_s27 }
  0x31   : > { %s1191_s5 = scalar_lea.hbm %s1426_s22, 2048  ;;  %s1196_s8 = scalar_lea.hbm %s1582_s0, 4096 }
  0x32   : > { %p1192_p0 = scmp.ne.s32.totalorder %s1426_s22, %s1191_s5  ;;  %p1193_p3 = pneg %p1428_p12 }
  0x33   : > { %p1197_p11 = scmp.lt.u32.totalorder %s1426_s22, %s1582_s0  ;;  %p1198_p1 = scmp.lt.u32.totalorder %s1196_s8, %s1191_s5 }
  0x34   : > { %p1194_p5 = pnand %p1193_p3, %p1192_p0  ;;  %p1200_p4 = scmp.lt.u32.totalorder %s1191_s5, %s1426_s22 }
  0x35   : > { %p1199_p2 = por %p1198_p1, %p1197_p11 }
  0x36   : > { %p1195_p7 = pneg %p1194_p5 }
  0x37   : > { %p1201_p6 = por %p1200_p4, %p1199_p2 }
  0x39   : > { %p1202_p9 = pnand %p1201_p6, %p1195_p7 }
  0x3b   : > { %1205 = shalt.err (!%p1202_p9)
}
  0x3c   : > { %s1206_s21 = scalar_lea.vmem %s1432_s27, 2048  ;;  %s1294_s24 = smov [#allocation4]  }
  0x3d   : > { %p1207_p10 = scmp.ne.s32.totalorder %s1432_s27, %s1206_s21  ;;  %s1211_s25 = sshll.u32 %s1294_s24, 4  ;;  %s1212_s25 = int_to_ptr.vmem [resolvable:$false] %s1211_s25 }
  0x3e   : > { %s1213_s28 = scalar_lea.vmem %s1212_s25, 4096  ;;  %p1214_p5 = scmp.lt.s32.totalorder %s1432_s27, %s1212_s25 }
  0x3f   : > { %p1209_p13 = pnand %p1207_p10, %p1193_p3  ;;  %p1215_p11 = scmp.lt.s32.totalorder %s1213_s28, %s1206_s21 }
  0x41   : > { %p1210_p0 = pneg %p1209_p13  ;;  %p1216_p1 = por %p1215_p11, %p1214_p5 }
  0x43   : > { %p1217_p2 = pnand %p1216_p1, %p1210_p0 }
  0x45   : > { %1220 = shalt.err (!%p1217_p2)
}
  0x46   : > { %1113 = dma.hbm_to_vmem [thread:$0]  (!%p1428_p12), %s1426_s22, 2048, %s1432_s27, %s145_s4  }
  0x47   : > { %p1600_p7 = scmp.ne.s32.totalorder %s1591_s20, 0 }
  0x48   : > { %s1462_s29 = sand.u32 (!%p1600_p7), 1, %s1283_s13   ;;  %p1601_p3 = scmp.ne.s32.totalorder (!%p1600_p7), %s1589_s18, 0 }
  0x49   : > { %165 = sbr.rel (%p1600_p7) target bundleno = 765 (0x2fd), region = 28  ;;  %s1070_s26 = sshll.u32 (!%p1600_p7), %s1462_s29, 7 }
  0x4a   : > { %s168_s5 = scalar_lea.sflag (!%p1600_p7), [#allocation5], %s1462_s29  ;;  %s1466_s6 = scalar_lea.vmem (!%p1600_p7), [#allocation4], %s1070_s26 }
  0x50   : > { %1266 = dma.done.wait (%p1601_p3), %s168_s5, 2048  }
  0x51   : > { %1268 = vsyncadd (%p1601_p3), %s168_s5, 4294965248  ;;  %p1602_p12 = scmp.eq.s32.totalorder %s1341_s16, 0 }
  0x53   : > { %1270 = dma.done.wait (%p1602_p12), [#allocation8], 128   ;;  %p1603_p4 = pmov %p1602_p12 }
  0x54   : > { %s1476_s20 = scalar_lea.vmem [#allocation9], %s1070_s26  ;;  %p1604_p6 = scmp.ne.s32.totalorder %s1341_s16, 0 }
  0x55   : > { %1272 = vsyncadd (%p1603_p4), [#allocation8], 4294967168  ;;  %vm204_vm0 = vcmask (!%p1604_p6), 7168   ;;  %v1295_v0 = vmov (!%p1604_p6), 0.0  }
  0x56   : > { %203 = sbr.rel (%p1604_p6) target bundleno = 93 (0x5d), region = 40  ;;  %205 = vst.msk [vmem:[#allocation2] sm:$0xff] (!%p1604_p6), %vm204_vm0, %v1295_v0  ;;  %206 = vst.msk [vmem:[#allocation3] sm:$0xff] (!%p1604_p6), %vm204_vm0, %v1295_v0 }
  0x5d PF: > { %v209_v1 = vld [vmem:[%s1466_s6 + $0x8] sm:$0xff]  ;;  %v208_v2 = vld [vmem:[%s1466_s6] sm:$0xff]  ;;  %vm224_vm1 = vcmask 64512   ;;  %v1296_v4 = vmov 0.0   ;;  %v211_v5 = vld [vmem:[%s1466_s6 + $0x18] sm:$0xff]  ;;  %vm831_vm2 = vcmask 7168  }
  0x5e   : > { %v1482_v3 = vld [vmem:[#allocation7] sm:$0xff]  ;;  %228 = vmatprep.subr.mxu0 %v209_v1  ;;  %292 = vmatprep.mubr.f32.mxu0 %v1296_v4  ;;  %v210_v6 = vld [vmem:[%s1466_s6 + $0x10] sm:$0xff]  ;;  %v213_v7 = vld [vmem:[%s1466_s6 + $0x28] sm:$0xff]  ;;  %p1082_p9 = scmp.ne.s32.totalorder %s1341_s16, 1 }
  0x5f   : > { %229 = vmatpush1.msra.mxu0 %v208_v2  ;;  %299 = vmatprep.subr.mxu1 %v211_v5  ;;  %v212_v8 = vld [vmem:[%s1466_s6 + $0x20] sm:$0xff]  ;;  %v215_v9 = vld [vmem:[%s1466_s6 + $0x38] sm:$0xff]  ;;  %v214_v10 = vld [vmem:[%s1466_s6 + $0x30] sm:$0xff]  ;;  %vm1298_vm3 = vmmov (!%p1082_p9), 0  }
  0x60   : > { %1074 = vmatmul.mubr.msk.f32.vlgmr.msra.gmra.mrb[0].mxu0 %vm224_vm1, %v1482_v3  ;;  %300 = vmatpush1.msra.mxu1 %v210_v6  ;;  %v217_v11 = vld [vmem:[%s1466_s6 + $0x48] sm:$0xff]  ;;  %v216_v12 = vld [vmem:[%s1466_s6 + $0x40] sm:$0xff]  ;;  %v219_v13 = vld [vmem:[%s1466_s6 + $0x58] sm:$0xff] }
  0x61   : > { %363 = vmatprep.mubr.f32.mxu1 %v1296_v4  ;;  %370 = vmatprep.subr.mxu0 %v213_v7  ;;  %v218_v14 = vld [vmem:[%s1466_s6 + $0x50] sm:$0xff]  ;;  %v221_v15 = vld [vmem:[%s1466_s6 + $0x68] sm:$0xff]  ;;  %v220_v16 = vld [vmem:[%s1466_s6 + $0x60] sm:$0xff] }
  0x62   : > { %1075 = vmatmul.mubr.msk.f32.vlgmr.msra.gmra.mrb[0].mxu1 %vm224_vm1, %v1482_v3  ;;  %371 = vmatpush1.msra.mxu0 %v212_v8  ;;  %v223_v17 = vld [vmem:[%s1466_s6 + $0x78] sm:$0xff]  ;;  %v222_v18 = vld [vmem:[%s1466_s6 + $0x70] sm:$0xff] }
  0x63   : > { %434 = vmatprep.mubr.f32.mxu0 %v1296_v4  ;;  %441 = vmatprep.subr.mxu1 %v215_v9 }
  0x64   : > { %1076 = vmatmul.mubr.msk.f32.vlgmr.msra.gmra.mrb[2].mxu0 %vm224_vm1, %v1482_v3  ;;  %442 = vmatpush1.msra.mxu1 %v214_v10 }
  0x65   : > { %505 = vmatprep.mubr.f32.mxu1 %v1296_v4  ;;  %512 = vmatprep.subr.mxu0 %v217_v11 }
  0x66   : > { %1077 = vmatmul.mubr.msk.f32.vlgmr.msra.gmra.mrb[2].mxu1 %vm224_vm1, %v1482_v3  ;;  %513 = vmatpush1.msra.mxu0 %v216_v12 }
  0x67   : > { %576 = vmatprep.mubr.f32.mxu0 %v1296_v4  ;;  %583 = vmatprep.subr.mxu1 %v219_v13 }
  0x68   : > { %1078 = vmatmul.mubr.msk.f32.vlgmr.msra.gmra.mrb[4].mxu0 %vm224_vm1, %v1482_v3  ;;  %584 = vmatpush1.msra.mxu1 %v218_v14 }
  0x69   : > { %647 = vmatprep.mubr.f32.mxu1 %v1296_v4  ;;  %654 = vmatprep.subr.mxu0 %v221_v15 }
  0x6a   : > { %1079 = vmatmul.mubr.msk.f32.vlgmr.msra.gmra.mrb[4].mxu1 %vm224_vm1, %v1482_v3  ;;  %655 = vmatpush1.msra.mxu0 %v220_v16 }
  0x6b   : > { %718 = vmatprep.mubr.f32.mxu0 %v1296_v4  ;;  %725 = vmatprep.subr.mxu1 %v223_v17 }
  0x6c   : > { %1080 = vmatmul.mubr.msk.f32.vlgmr.msra.gmra.mrb[6].mxu0 %vm224_vm1, %v1482_v3  ;;  %726 = vmatpush1.msra.mxu1 %v222_v18  ;;  %v812_v18 = vld [vmem:[#allocation2] sm:$0xff] }
  0x6d   : > { %789 = vmatprep.mubr.f32.mxu1 %v1296_v4 }
  0x6e   : > { %1081 = vmatmul.mubr.msk.f32.vlgmr.msra.gmra.mrb[6].mxu1 %vm224_vm1, %v1482_v3 }
 0x133   : > { %v294_v19 = vpop.f32.mrb[0].mxu0 }
 0x134   : > { %796 = vst [vmem:[%s1476_s20] sm:$0xff] %v294_v19  ;;  %v834_v20 = vmul.f32 %v294_v19, %v294_v19  ;;  %v296_v21 = vpop.f32.mrb[1].mxu0 }
 0x135   : > { %797 = vst [vmem:[%s1476_s20 + $0x8] sm:$0xff] %v296_v21  ;;  %v813_v22 = vadd.f32 %v296_v21, %v294_v19  ;;  %v835_v23 = vmul.f32 %v296_v21, %v296_v21  ;;  %v365_v24 = vpop.f32.mrb[0].mxu1  ;;  %v833_v21 = vld [vmem:[#allocation3] sm:$0xff] }
 0x136   : > { %798 = vst [vmem:[%s1476_s20 + $0x10] sm:$0xff] %v365_v24  ;;  %v836_v25 = vmul.f32 %v365_v24, %v365_v24  ;;  %v367_v26 = vpop.f32.mrb[1].mxu1 }
 0x137   : > { %v850_v27 = vadd.f32 %v835_v23, %v834_v20  ;;  %v814_v28 = vadd.f32 %v813_v22, %v365_v24  ;;  %799 = vst [vmem:[%s1476_s20 + $0x18] sm:$0xff] %v367_v26  ;;  %v436_v29 = vpop.f32.mrb[2].mxu0  ;;  %v837_v33 = vmul.f32 %v367_v26, %v367_v26 }
 0x138   : > { %800 = vst [vmem:[%s1476_s20 + $0x20] sm:$0xff] %v436_v29  ;;  %v438_v30 = vpop.f32.mrb[3].mxu0  ;;  %v838_v34 = vmul.f32 %v436_v29, %v436_v29 }
 0x139   : > { %v851_v31 = vadd.f32 %v850_v27, %v836_v25  ;;  %v815_v32 = vadd.f32 %v814_v28, %v367_v26  ;;  %801 = vst [vmem:[%s1476_s20 + $0x28] sm:$0xff] %v438_v30  ;;  %v507_v35 = vpop.f32.mrb[2].mxu1  ;;  %v839_v43 = vmul.f32 %v438_v30, %v438_v30  ;;  %v1297_v25 = vmov (!%p1082_p9), 0.0  }
 0x13a   : > { %802 = vst [vmem:[%s1476_s20 + $0x30] sm:$0xff] %v507_v35  ;;  %v509_v36 = vpop.f32.mrb[3].mxu1  ;;  %v840_v44 = vmul.f32 %v507_v35, %v507_v35  ;;  %1093 = vmatprep.subr.mxu0 (!%p1082_p9), %v1297_v25  ;;  %1095 = vmatprep.mubr.msk.f32.mxu0 (!%p1082_p9), %vm1298_vm3, %v1297_v25 }
 0x13b   : > { %v852_v37 = vadd.f32 %v851_v31, %v837_v33  ;;  %v816_v38 = vadd.f32 %v815_v32, %v436_v29  ;;  %803 = vst [vmem:[%s1476_s20 + $0x38] sm:$0xff] %v509_v36  ;;  %v578_v39 = vpop.f32.mrb[4].mxu0  ;;  %v841_v53 = vmul.f32 %v509_v36, %v509_v36 }
 0x13c   : > { %804 = vst [vmem:[%s1476_s20 + $0x40] sm:$0xff] %v578_v39  ;;  %v580_v40 = vpop.f32.mrb[5].mxu0  ;;  %v842_v54 = vmul.f32 %v578_v39, %v578_v39 }
 0x13d   : > { %v853_v41 = vadd.f32 %v852_v37, %v838_v34  ;;  %v817_v42 = vadd.f32 %v816_v38, %v438_v30  ;;  %805 = vst [vmem:[%s1476_s20 + $0x48] sm:$0xff] %v580_v40  ;;  %v649_v45 = vpop.f32.mrb[4].mxu1  ;;  %v843_v61 = vmul.f32 %v580_v40, %v580_v40 }
 0x13e   : > { %806 = vst [vmem:[%s1476_s20 + $0x50] sm:$0xff] %v649_v45  ;;  %v651_v46 = vpop.f32.mrb[5].mxu1  ;;  %v844_v62 = vmul.f32 %v649_v45, %v649_v45 }
 0x13f   : > { %v854_v47 = vadd.f32 %v853_v41, %v839_v43  ;;  %v818_v48 = vadd.f32 %v817_v42, %v507_v35  ;;  %807 = vst [vmem:[%s1476_s20 + $0x58] sm:$0xff] %v651_v46  ;;  %v720_v49 = vpop.f32.mrb[6].mxu0  ;;  %v845_v4 = vmul.f32 %v651_v46, %v651_v46 }
 0x140   : > { %808 = vst [vmem:[%s1476_s20 + $0x60] sm:$0xff] %v720_v49  ;;  %v722_v50 = vpop.f32.mrb[7].mxu0  ;;  %v846_v5 = vmul.f32 %v720_v49, %v720_v49 }
 0x141   : > { %v855_v51 = vadd.f32 %v854_v47, %v840_v44  ;;  %v819_v52 = vadd.f32 %v818_v48, %v509_v36  ;;  %809 = vst [vmem:[%s1476_s20 + $0x68] sm:$0xff] %v722_v50  ;;  %v791_v55 = vpop.f32.mrb[6].mxu1  ;;  %v847_v10 = vmul.f32 %v722_v50, %v722_v50 }
 0x142   : > { %810 = vst [vmem:[%s1476_s20 + $0x70] sm:$0xff] %v791_v55  ;;  %v793_v56 = vpop.f32.mrb[7].mxu1  ;;  %v848_v11 = vmul.f32 %v791_v55, %v791_v55 }
 0x143   : > { %v856_v57 = vadd.f32 %v855_v51, %v841_v53  ;;  %v820_v58 = vadd.f32 %v819_v52, %v578_v39  ;;  %811 = vst [vmem:[%s1476_s20 + $0x78] sm:$0xff] %v793_v56  ;;  %v849_v14 = vmul.f32 %v793_v56, %v793_v56 }
 0x145   : > { %v857_v59 = vadd.f32 %v856_v57, %v842_v54  ;;  %v821_v60 = vadd.f32 %v820_v58, %v580_v40 }
 0x147   : > { %v858_v63 = vadd.f32 %v857_v59, %v843_v61  ;;  %v822_v0 = vadd.f32 %v821_v60, %v649_v45 }
 0x149   : > { %v859_v1 = vadd.f32 %v858_v63, %v844_v62  ;;  %v823_v2 = vadd.f32 %v822_v0, %v651_v46 }
 0x14b   : > { %v860_v6 = vadd.f32 %v859_v1, %v845_v4  ;;  %v824_v7 = vadd.f32 %v823_v2, %v720_v49 }
 0x14d   : > { %v861_v8 = vadd.f32 %v860_v6, %v846_v5  ;;  %v825_v9 = vadd.f32 %v824_v7, %v722_v50 }
 0x14f   : > { %v862_v12 = vadd.f32 %v861_v8, %v847_v10  ;;  %v826_v13 = vadd.f32 %v825_v9, %v791_v55 }
 0x151   : > { %v827_v15 = vadd.f32 %v826_v13, %v793_v56  ;;  %v863_v16 = vadd.f32 %v862_v12, %v848_v11 }
 0x153   : > { %828 = vadd.xlane.f32.xlu0 %v827_v15  ;;  %v864_v17 = vadd.f32 %v863_v16, %v849_v14 }
 0x157   : > { %865 = vadd.xlane.f32.xlu0 %v864_v17 }
 0x1e0   : > { %v829_v19 = vpop.xlane.xlu0 %828 }
 0x1e1   : > { %v830_v20 = vadd.f32 %v829_v19, %v812_v18  ;;  %872 = sbr.rel (%p1082_p9) target bundleno = 741 (0x2e5), region = 44 }
 0x1e3   : > { %832 = vst.msk [vmem:[#allocation2] sm:$0xff] %vm831_vm2, %v830_v20 }
 0x1e4   : > { %v866_v22 = vpop.xlane.xlu0 %865 }
 0x1e5   : > { %v867_v23 = vadd.f32 %v866_v22, %v833_v21 }
 0x1e7   : > { %868 = vst.msk [vmem:[#allocation3] sm:$0xff] %vm831_vm2, %v867_v23 }
 0x1ea   : > { %v873_v24 = vld [vmem:[#allocation2] sm:$0xff] }
 0x1eb   : > { %v875_v26 = vmul.f32 0.00024414063, %v873_v24 }
 0x1ed   : > { %v877_v27 = vmul.f32 4096.0, %v875_v26 }
 0x1ee   : > { %v876_v28 = vld [vmem:[#allocation3] sm:$0xff] }
 0x1ef   : > { %v878_v29 = vmul.f32 %v877_v27, %v875_v26 }
 0x1f1   : > { %v879_v30 = vsub.f32 %v876_v28, %v878_v29 }
 0x1f3   : > { %v881_v31 = vmul.f32 0.00024420026, %v879_v30 }
 0x1f5   : > { %1159 = vrsqrt.f32 %v881_v31  ;;  %vm884_vm4 = vcmp.eq.f32.partialorder %v881_v31, inf  ;;  %v887_v33 = vand.u32 2147483648, %v881_v31  ;;  %vm886_vm5 = vcmp.eq.f32.partialorder %v881_v31, 0.0 }
 0x1ff   : > { %v1160_v32 = vpop.eup %1159 }
 0x200   : > { %v883_v34 = vmul.f32 %v1160_v32, %v881_v31 }
 0x202   : > { %v885_v35 = vsel %vm884_vm4, %v881_v31, %v883_v34 }
 0x203   : > { %v888_v36 = vsel %vm886_vm5, %v887_v33, %v885_v35 }
 0x204   : > { %1094 = vmatpush3.msra.mxu0 %v888_v36 }
 0x205   : > { %1096 = vmatmul.mubr.msk.f32.vlgmr.msra.gmra.mrb[0].mxu0 %vm224_vm1, %v1482_v3 }
 0x2d8   : > { %v955_v37 = vpop.f32.mrb[0].mxu0 }
 0x2d9   : > { %1161 = vrcp.f32 %v955_v37  ;;  %v1097_v38 = vpop.f32.mrb[1].mxu0 }
 0x2e3   : > { %v1162_v39 = vpop.eup %1161 }
 0x2e4   : > { %960 = vst.msk [vmem:[%s1585_s3] sm:$0xff] %vm831_vm2, %v1162_v39 }
 0x2e5 PF: > { %s1090_s27 = sshll.u32 %s1341_s16, 11  ;;  %s976_s8 = sshll.u32 %s1476_s20, 4  ;;  %s977_s8 = int_to_ptr.vmem [resolvable:$true] %s976_s8 }
 0x2e6   : > { %s1543_s7 = scalar_lea.hbm %s1584_s2, %s1090_s27  ;;  %s962_s9 = scalar_lea.sflag [#allocation6], %s1462_s29 }
 0x2e7   : > { %s1221_s10 = scalar_lea.vmem %s977_s8, 2048  ;;  %s1299_s21 = smov [#allocation9]  }
 0x2e8   : > { %p1222_p10 = scmp.ne.s32.totalorder %s977_s8, %s1221_s10  ;;  %s1225_s24 = sshll.u32 %s1299_s21, 4  ;;  %s1226_s24 = int_to_ptr.vmem [resolvable:$false] %s1225_s24 }
 0x2e9   : > { %s1227_s25 = scalar_lea.vmem %s1226_s24, 4096  ;;  %p1228_p5 = scmp.lt.s32.totalorder %s977_s8, %s1226_s24 }
 0x2ea   : > { %p1223_p13 = pnand %p1222_p10, %p1413_p8  ;;  %p1229_p11 = scmp.lt.s32.totalorder %s1227_s25, %s1221_s10 }
 0x2ec   : > { %p1224_p0 = pneg %p1223_p13  ;;  %p1230_p1 = por %p1229_p11, %p1228_p5 }
 0x2ee   : > { %p1231_p2 = pnand %p1230_p1, %p1224_p0 }
 0x2f0   : > { %1234 = shalt.err (!%p1231_p2)
}
 0x2f1   : > { %s1235_s16 = scalar_lea.hbm %s1543_s7, 2048  ;;  %s1239_s26 = scalar_lea.hbm %s1584_s2, 4096 }
 0x2f2   : > { %p1236_p7 = scmp.ne.s32.totalorder %s1543_s7, %s1235_s16  ;;  %p1240_p4 = scmp.lt.u32.totalorder %s1543_s7, %s1584_s2 }
 0x2f3   : > { %p1241_p6 = scmp.lt.u32.totalorder %s1239_s26, %s1235_s16  ;;  %p1243_p10 = scmp.lt.u32.totalorder %s1235_s16, %s1543_s7 }
 0x2f4   : > { %p1237_p3 = pnand %p1236_p7, %p1413_p8 }
 0x2f5   : > { %p1242_p9 = por %p1241_p6, %p1240_p4 }
 0x2f6   : > { %p1238_p12 = pneg %p1237_p3 }
 0x2f7   : > { %p1244_p13 = por %p1243_p10, %p1242_p9 }
 0x2f9   : > { %p1245_p0 = pnand %p1244_p13, %p1238_p12 }
 0x2fb   : > { %1248 = shalt.err (!%p1245_p0)
}
 0x2fc   : > { %1104 = dma.vmem_to_hbm [thread:$0]  (%p1413_p8), %s977_s8, 2048, %s1543_s7, %s962_s9  }
 0x2fd PF: > { %s994_s20 = sand.u32 1, %s1279_s12   ;;  %p1605_p5 = scmp.ne.s32.totalorder %s1590_s19, 0 }
 0x2fe   : > { %p1606_p11 = scmp.ge.s32.totalorder %s1291_s15, 2  ;;  %s995_s18 = scalar_lea.sflag [#allocation6], %s994_s20 }
 0x300   : > { %p1115_p1 = pnand %p1606_p11, %p1605_p5 }
 0x302   : > { %1274 = dma.done.wait (!%p1115_p1), %s995_s18, 2048  }
 0x303   : > { %1276 = vsyncadd (!%p1115_p1), %s995_s18, 4294965248  ;;  %p18_p2 = scmp.ge.s32.totalorder %s1369_s23, 4   ;;  %s1607_s12 = smov %s1283_s13 }
 0x304   : > { %s1608_s13 = smov %s1287_s14  ;;  %s1609_s14 = smov %s1405_s11 }
 0x305   : > { %s1610_s15 = smov %s1369_s23  ;;  %20 = sbr.rel (!%p18_p2) target bundleno = 6 (0x6), region = 93 }
 0x30c   :  { %1000 = vsyncpa [#allocation5], 1 }
 0x30d   :  { %1002 = vsyncpa [#allocation5 + $0x1], 1 }
 0x30e   :  { %1003 = vsyncpa [#allocation8], 1 }
 0x30f   :  { %1004 = vsyncpa [#allocation6], 1 }
 0x310   :  { %1006 = vsyncpa [#allocation6 + $0x1], 1 }

</bundles_post_ra>
